<compile_context>
chip_gen: v6e
topology: v6e:2x2x1
jax: 0.10.0
libtpu: 0.0.40
codegen_flags: <defaults>
</compile_context>

<pallas_src>
import functools

import numpy as np

import jax
import jax.numpy as jnp
from jax.experimental import pallas as pl
from jax.experimental.pallas import tpu as pltpu

_LANE = 128


def _round_up(v, m):
    return ((v + m - 1) // m) * m


def _select_row_tile(n, row_tile):
    """Pick the row tile for the 1-D grid over N."""
    if n <= 128:
        # Single grid step; x/out blocks are f32 so 8-row sublane alignment
        # suffices (16 would only matter for bf16-packed input blocks).
        return _round_up(max(n, 1), 8)
    # Mid-size N: guarantee >= 2 grid steps so the "parallel" axis can be
    # sharded over both v7x TensorCores, while keeping M >= 128 per step for
    # the MXU. Large N simply uses row_tile (256 default; 128 on v5e).
    two_step = _round_up((n + 1) // 2, 8)
    return min(row_tile, max(128, two_step))


def _fused_predictor_kernel(x_ref, w_ref, b_ref, scores_ref, bbox_ref):
    # Cast x to the weight compute dtype (bf16) on the VPU, do ONE wide MXU
    # pass (tile, R) @ (R, P) with f32 accumulation, add the f32 fused bias,
    # then split on the 128-lane segment boundary and store two lane-dense
    # outputs.
    x = x_ref[...].astype(w_ref.dtype)
    acc = jnp.dot(x, w_ref[...], preferred_element_type=jnp.float32)
    acc = acc + b_ref[...]
    pc = scores_ref.shape[-1]          # static: padded cls width (128-aligned)
    scores_ref[...] = acc[:, :pc].astype(scores_ref.dtype)
    bbox_ref[...] = acc[:, pc:].astype(bbox_ref.dtype)


def prepare_params(w_cls, b_cls, w_bbox, b_bbox, *,
                   compute_dtype=jnp.bfloat16, lane_align=_LANE):
    """One-time parameter preparation (hoisted out of the forward path).

    Fuses the two Linears along the output axis with SEGMENT-ALIGNED padding:
      columns [0, Pc)        -> cls      (Pc = round_up(C, 128))
      columns [Pc, Pc + Pb)  -> bbox     (Pb = round_up(B4, 128))
    Weights are pre-transposed to (R, P) and cast to bf16; the fused bias
    stays f32 as a (1, P) row.
    """
    C, R = w_cls.shape
    B4 = w_bbox.shape[0]
    Pc = _round_up(C, lane_align)
    Pb = _round_up(B4, lane_align)
    P = Pc + Pb

    w_pad = jnp.zeros((R, P), compute_dtype)
    w_pad = w_pad.at[:, :C].set(w_cls.T.astype(compute_dtype))
    w_pad = w_pad.at[:, Pc:Pc + B4].set(w_bbox.T.astype(compute_dtype))

    b_pad = jnp.zeros((1, P), jnp.float32)
    b_pad = b_pad.at[:, :C].set(b_cls.astype(jnp.float32)[None, :])
    b_pad = b_pad.at[:, Pc:Pc + B4].set(b_bbox.astype(jnp.float32)[None, :])
    return w_pad, b_pad, C, B4


@functools.partial(
    jax.jit,
    static_argnames=("num_classes", "num_bbox_out", "row_tile", "out_dtype"))
def fpn_predictor_2nd(x, w_pad, b_pad, *, num_classes, num_bbox_out,
                      row_tile=256, out_dtype=None):
    """x: (N, R) f32; w_pad: (R, P) bf16 fused+segment-padded; b_pad: (1, P) f32.

    Returns (scores (N, C), bbox_deltas (N, B4)) — same math as the PyTorch
    module's two nn.Linear layers (bf16 operands, f32 accumulation).
    `row_tile`: 256 (default, v6e/v7x) or 128 (v5e). `out_dtype`: defaults to
    x.dtype (f32, module semantics); jnp.bfloat16 halves output HBM traffic.
    """
    N, R = x.shape
    P = w_pad.shape[1]
    Pc = _round_up(num_classes, _LANE)
    Pb = P - Pc
    out_dtype = x.dtype if out_dtype is None else out_dtype

    if N == 0:  # empty RoI batch: nothing to launch
        return (jnp.zeros((0, num_classes), out_dtype),
                jnp.zeros((0, num_bbox_out), out_dtype))

    tile = _select_row_tile(N, row_tile)
    grid = (pl.cdiv(N, tile),)

    x_bytes = x.dtype.itemsize
    w_bytes = w_pad.dtype.itemsize
    o_bytes = np.dtype(out_dtype).itemsize

    # VMEM footprint of the pipeline (double-buffered tiles + resident
    # weight/bias), clamped to limits valid on every TPU generation.
    est_vmem = (2 * tile * R * x_bytes            # x row tiles
                + 2 * R * P * w_bytes             # fused weight (dbl-buffered)
                + 2 * P * 4                       # fused bias
                + 2 * tile * P * o_bytes)         # output row tiles
    vmem_limit = int(min(64 * 1024 * 1024,
                         max(32 * 1024 * 1024, 2 * est_vmem)))

    cost = pl.CostEstimate(
        flops=2 * N * R * P,
        transcendentals=0,
        bytes_accessed=(N * R * x_bytes + R * P * w_bytes + P * 4
                        + N * P * o_bytes))

    scores_pad, bbox_pad = pl.pallas_call(
        _fused_predictor_kernel,
        out_shape=(jax.ShapeDtypeStruct((N, Pc), out_dtype),
                   jax.ShapeDtypeStruct((N, Pb), out_dtype)),
        grid_spec=pltpu.PrefetchScalarGridSpec(
            num_scalar_prefetch=0,
            grid=grid,
            in_specs=[
                # x row tile: streamed / double-buffered; ragged last tile is
                # masked by Pallas (rows independent -> garbage never leaks).
                pl.BlockSpec((tile, R), lambda i: (i, 0)),
                # Fused weight & bias: same block every step -> VMEM-resident.
                pl.BlockSpec((R, P), lambda i: (0, 0)),
                pl.BlockSpec((1, P), lambda i: (0, 0)),
            ],
            out_specs=[
                pl.BlockSpec((tile, Pc), lambda i: (i, 0)),
                pl.BlockSpec((tile, Pb), lambda i: (i, 0)),
            ],
        ),
        compiler_params=pltpu.CompilerParams(
            # Independent row tiles: shard across v7x's 2 TensorCores.
            dimension_semantics=("parallel",),
            vmem_limit_bytes=vmem_limit,
        ),
        cost_estimate=cost,
    )(x, w_pad, b_pad)

    # Prefix column slices only (segments are 128-lane aligned inside the
    # kernel, so no cross-lane relayout pass is needed here).
    return scores_pad[:, :num_classes], bbox_pad[:, :num_bbox_out]


def init_params(key, representation_size, num_classes,
                cls_agnostic_bbox_reg=False):
    """Deterministic parameter init matching FPNPredictor_2nd.__init__."""
    num_bbox_reg_classes = 1 if cls_agnostic_bbox_reg else num_classes
    k1, k2 = jax.random.split(key, 2)
    # nn.init.normal_(weight, std=0.001) for both heads.
    w_cls = 0.001 * jax.random.normal(
        k1, (num_classes, representation_size), dtype=jnp.float32)
    w_bbox = 0.001 * jax.random.normal(
        k2, (num_bbox_reg_classes * 4, representation_size), dtype=jnp.float32)
    # cls bias = -log((1 - 0.01) / 0.01); bbox bias = 0 (as in the spec).
    bias_value = -jnp.log(jnp.array((1.0 - 0.01) / 0.01, dtype=jnp.float32))
    b_cls = jnp.full((num_classes,), bias_value, dtype=jnp.float32)
    b_bbox = jnp.zeros((num_bbox_reg_classes * 4,), dtype=jnp.float32)
    return w_cls, b_cls, w_bbox, b_bbox


if __name__ == "__main__":
    # Small shapes consistent with the module's forward: x is (N, MLP_HEAD_DIM).
    N = 8                    # number of RoIs
    REPR = 32                # MLP_HEAD_DIM
    NUM_CLASSES = 16
    CLS_AGNOSTIC = False

    key = jax.random.PRNGKey(0)
    kx, kp, kx2 = jax.random.split(key, 3)
    x = jax.random.normal(kx, (N, REPR), dtype=jnp.float32)

    w_cls, b_cls, w_bbox, b_bbox = init_params(kp, REPR, NUM_CLASSES,
                                               CLS_AGNOSTIC)

    # One-time fused/segment-padded/bf16 parameter prep (outside the forward).
    w_pad, b_pad, C, B4 = prepare_params(w_cls, b_cls, w_bbox, b_bbox)

    scores, bbox_deltas = fpn_predictor_2nd(
        x, w_pad, b_pad, num_classes=C, num_bbox_out=B4)
    jax.block_until_ready((scores, bbox_deltas))

    assert scores.shape == (N, NUM_CLASSES)
    assert bbox_deltas.shape == (N, NUM_CLASSES * 4)

    # Reference with matching operand rounding (bf16 operands, f32 accum).
    x_r = x.astype(jnp.bfloat16).astype(jnp.float32)
    wc_r = w_cls.astype(jnp.bfloat16).astype(jnp.float32)
    wb_r = w_bbox.astype(jnp.bfloat16).astype(jnp.float32)
    assert jnp.allclose(scores, x_r @ wc_r.T + b_cls, atol=1e-4, rtol=1e-4)
    assert jnp.allclose(bbox_deltas, x_r @ wb_r.T + b_bbox, atol=1e-4,
                        rtol=1e-4)

    # Sanity vs. exact f32 PyTorch math (looser tol from bf16 operand rounding).
    assert jnp.allclose(scores, x @ w_cls.T + b_cls, atol=5e-3, rtol=5e-3)
    assert jnp.allclose(bbox_deltas, x @ w_bbox.T + b_bbox, atol=5e-3,
                        rtol=5e-3)

    # Ragged / multi-step grid path (N not a multiple of the tile, 2 steps).
    N2 = 200
    x2 = jax.random.normal(kx2, (N2, REPR), dtype=jnp.float32)
    s2, d2 = fpn_predictor_2nd(x2, w_pad, b_pad, num_classes=C, num_bbox_out=B4)
    jax.block_until_ready((s2, d2))
    x2_r = x2.astype(jnp.bfloat16).astype(jnp.float32)
    assert s2.shape == (N2, NUM_CLASSES) and d2.shape == (N2, NUM_CLASSES * 4)
    assert jnp.allclose(s2, x2_r @ wc_r.T + b_cls, atol=1e-4, rtol=1e-4)
    assert jnp.allclose(d2, x2_r @ wb_r.T + b_bbox, atol=1e-4, rtol=1e-4)

    # Empty-RoI guard (no kernel launch).
    s0, d0 = fpn_predictor_2nd(jnp.zeros((0, REPR), jnp.float32), w_pad, b_pad,
                               num_classes=C, num_bbox_out=B4)
    assert s0.shape == (0, NUM_CLASSES) and d0.shape == (0, NUM_CLASSES * 4)

    print("KERNEL_OK")
</pallas_src>

<mosaic_0001>
module attributes {stable_mosaic.version = 11 : i64} {
  func.func @_fused_predictor_kernel(%arg0: i32, %arg1: memref<8x32xf32, #tpu.memory_space<vmem>>, %arg2: memref<32x256xbf16, #tpu.memory_space<vmem>>, %arg3: memref<1x256xf32, #tpu.memory_space<vmem>>, %arg4: memref<8x128xf32, #tpu.memory_space<vmem>>, %arg5: memref<8x128xf32, #tpu.memory_space<vmem>>) attributes {dimension_semantics = [#tpu.dimension_semantics<parallel>], iteration_bounds = array<i64: 1>, scalar_prefetch = 0 : i64, scratch_operands = 0 : i64, tpu.core_type = #tpu.core_type<tc>, window_params = [{transform_indices = @transform_0, window_bounds = array<i64: 8, 32>}, {pipeline_mode = #tpu.pipeline_mode<synchronous>, transform_indices = @transform_1, window_bounds = array<i64: 32, 256>}, {pipeline_mode = #tpu.pipeline_mode<synchronous>, transform_indices = @transform_2, window_bounds = array<i64: 1, 256>}, {transform_indices = @transform_3, window_bounds = array<i64: 8, 128>}, {transform_indices = @transform_4, window_bounds = array<i64: 8, 128>}]} {
    %c0 = arith.constant 0 : index
    %c0_0 = arith.constant 0 : index
    %0 = vector.load %arg1[%c0, %c0_0] : memref<8x32xf32, #tpu.memory_space<vmem>>, vector<8x32xf32>
    %1 = arith.truncf %0 : vector<8x32xf32> to vector<8x32xbf16>
    %c0_1 = arith.constant 0 : index
    %c0_2 = arith.constant 0 : index
    %2 = vector.load %arg2[%c0_1, %c0_2] : memref<32x256xbf16, #tpu.memory_space<vmem>>, vector<32x256xbf16>
    %cst = arith.constant dense<0.000000e+00> : vector<8x256xf32>
    %3 = tpu.matmul %1, %2, %cst {dimension_numbers = #tpu.dot_dimension_numbers<[1], [0], [0], [1], [0, 0, 1, 1], [], []>} : vector<8x32xbf16>, vector<32x256xbf16>, vector<8x256xf32> -> vector<8x256xf32>
    %c0_3 = arith.constant 0 : index
    %c0_4 = arith.constant 0 : index
    %4 = vector.load %arg3[%c0_3, %c0_4] : memref<1x256xf32, #tpu.memory_space<vmem>>, vector<1x256xf32>
    %5 = vector.broadcast %4 : vector<1x256xf32> to vector<8x256xf32>
    %6 = arith.addf %3, %5 : vector<8x256xf32>
    %7 = vector.extract_strided_slice %6 {offsets = [0, 0], sizes = [8, 128], strides = [1, 1]} : vector<8x256xf32> to vector<8x128xf32>
    %c0_5 = arith.constant 0 : index
    %c0_6 = arith.constant 0 : index
    %8 = vector.load %arg4[%c0_5, %c0_6] : memref<8x128xf32, #tpu.memory_space<vmem>>, vector<8x128xf32>
    tpu.vector_store %arg4[%c0_5, %c0_6], %7 {strides = array<i32>} : memref<8x128xf32, #tpu.memory_space<vmem>>, vector<8x128xf32>,
    %9 = vector.extract_strided_slice %6 {offsets = [0, 128], sizes = [8, 128], strides = [1, 1]} : vector<8x256xf32> to vector<8x128xf32>
    %c0_7 = arith.constant 0 : index
    %c0_8 = arith.constant 0 : index
    %10 = vector.load %arg5[%c0_7, %c0_8] : memref<8x128xf32, #tpu.memory_space<vmem>>, vector<8x128xf32>
    tpu.vector_store %arg5[%c0_7, %c0_8], %9 {strides = array<i32>} : memref<8x128xf32, #tpu.memory_space<vmem>>, vector<8x128xf32>,
    return
  }
  func.func @transform_0(%arg0: i32) -> (i32, i32) {
    %c0_i32 = arith.constant 0 : i32
    %c0_i32_0 = arith.constant 0 : i32
    return %arg0, %c0_i32 : i32, i32
  }
  func.func @transform_1(%arg0: i32) -> (i32, i32) {
    %c0_i32 = arith.constant 0 : i32
    %c0_i32_0 = arith.constant 0 : i32
    %c0_i32_1 = arith.constant 0 : i32
    return %c0_i32, %c0_i32_0 : i32, i32
  }
  func.func @transform_2(%arg0: i32) -> (i32, i32) {
    %c0_i32 = arith.constant 0 : i32
    %c0_i32_0 = arith.constant 0 : i32
    %c0_i32_1 = arith.constant 0 : i32
    return %c0_i32, %c0_i32_0 : i32, i32
  }
  func.func @transform_3(%arg0: i32) -> (i32, i32) {
    %c0_i32 = arith.constant 0 : i32
    %c0_i32_0 = arith.constant 0 : i32
    return %arg0, %c0_i32 : i32, i32
  }
  func.func @transform_4(%arg0: i32) -> (i32, i32) {
    %c0_i32 = arith.constant 0 : i32
    %c0_i32_0 = arith.constant 0 : i32
    return %arg0, %c0_i32 : i32, i32
  }
}

</mosaic_0001>

<bundles_post_ra>
// kernel: fpn_predictor_2nd.1
= control target key start
LH: loop header
LB: loop body
LE: loop exit
PB: predicated region body
PF: predicated region fallthrough
CT: control target
= control target key end

     0   :  { %10 = vsyncpa [#allocation3], 0  ;;  %s313_s0 = inlined_call_operand.hbm [shape: f32[8,32], index: 0, kind: input, shape index: {}]   ;;  %s314_s1 = inlined_call_operand.hbm [shape: bf16[32,256], index: 1, kind: input, shape index: {}]   ;;  %s315_s2 = inlined_call_operand.vmem [shape: f32[1,256], index: 2, kind: input, shape index: {}]   ;;  %s316_s3 = inlined_call_operand.hbm [shape: f32[8,128], index: 3, kind: output, shape index: {0}]   ;;  %s317_s4 = inlined_call_operand.hbm [shape: f32[8,128], index: 4, kind: output, shape index: {1}]  }
   0x1   :  { %11 = vsyncpa [#allocation6], 0 }
   0x2   :  { %12 = vsyncpa [#allocation4], 0 }
   0x3   :  { %13 = vsyncpa [#allocation9], 0  ;;  %s266_s15 = smov [#allocation2]   ;;  %s267_s17 = smov [#allocation5]  }
   0x4   :  { %s20_s16 = sshll.u32 %s266_s15, 4  ;;  %s29_s18 = sshll.u32 %s267_s17, 4  ;;  %s21_s16 = int_to_ptr.vmem [resolvable:$true] %s20_s16  ;;  %s30_s18 = int_to_ptr.vmem [resolvable:$true] %s29_s18 }
   0x5   :  { %s186_s19 = scalar_lea.vmem %s21_s16, 128  ;;  %p191_p1 = scmp.lt.s32.totalorder %s21_s16, %s21_s16 }
   0x6   :  { %p187_p0 = scmp.ne.s32.totalorder %s21_s16, %s186_s19  ;;  %p192_p2 = scmp.lt.s32.totalorder %s186_s19, %s186_s19 }
   0x8   :  { %p193_p3 = por %p192_p2, %p191_p1 }
   0xa   :  { %p194_p4 = pnand %p193_p3, %p187_p0 }
   0xc   :  { %197 = shalt.err (!%p194_p4)
}
   0xd   :  { %23 = dma.hbm_to_vmem [thread:$0]  %s313_s0, 128, %s21_s16, [#allocation3]  }
   0xe   :  { %s206_s22 = scalar_lea.vmem %s30_s18, 512  ;;  %p211_p6 = scmp.lt.s32.totalorder %s30_s18, %s30_s18 }
   0xf   :  { %p207_p5 = scmp.ne.s32.totalorder %s30_s18, %s206_s22  ;;  %p212_p7 = scmp.lt.s32.totalorder %s206_s22, %s206_s22 }
  0x11   :  { %p213_p8 = por %p212_p7, %p211_p6 }
  0x13   :  { %p214_p9 = pnand %p213_p8, %p207_p5 }
  0x15   :  { %217 = shalt.err (!%p214_p9)
}
  0x16   :  { %s268_s23 = smov 128   ;;  %s269_s24 = smov 8  }
  0x17   :  { %35 = dma.hbm_to_vmem [thread:$0]  %s314_s1, 512, %s30_s18, [#allocation6], %s268_s23, %s268_s23, %s269_s24  }
  0x18   :  { %258 = dma.done.wait [#allocation3], 128  }
  0x19   :  { %259 = vsyncadd [#allocation3], 4294967168 }
  0x1a   :  { %260 = dma.done.wait [#allocation6], 512  }
  0x1b   :  { %261 = vsyncadd [#allocation6], 4294966784  ;;  %v270_v0 = vmov 0   ;;  %v172_v1 = vld [vmem:[#allocation5 + $0x14] ss:$8 sps:$4 sm:$0xff]   ;;  %vm83_vm0 = vcmask 261120   ;;  %v53_v7 = vlaneseq }
  0x1c   :  { %119 = vmatprep.mubr.bf16.mxu0 %v270_v0  ;;  %v174_v2 = vld [vmem:[#allocation5 + $0x10] ss:$8 sps:$4 sm:$0xff]   ;;  %99 = vmatprep.subr.bf16.mxu0 %v172_v1  ;;  %v175_v3 = vld [vmem:[#allocation5 + $0x4] ss:$8 sps:$4 sm:$0xff]   ;;  %v177_v4 = vld [vmem:[#allocation5] ss:$8 sps:$4 sm:$0xff]  }
  0x1d   :  { %100 = vmatpush1.bf16.msra.mxu0 %v174_v2  ;;  %v45_v5 = vld [vmem:[#allocation2] sm:$0xff]  ;;  %v54_v8 = vshrl.u32 %v53_v7, 7  ;;  %s271_s27 = smov [#allocation7]   ;;  %s272_s29 = smov [#allocation8]  }
  0x1e   :  { %101 = vmatprep.subr.bf16.mxu0 %v175_v3  ;;  %v46_v6 = vpack.c.bf16 %v45_v5, %v45_v5  ;;  %v51_v10 = vld [vmem:[%s315_s2] sm:$0x3]  ;;  %s136_s28 = sshll.u32 %s271_s27, 4  ;;  %s146_s30 = sshll.u32 %s272_s29, 4  ;;  %s137_s28 = int_to_ptr.vmem [resolvable:$true] %s136_s28  ;;  %s147_s30 = int_to_ptr.vmem [resolvable:$true] %s146_s30 }
  0x1f   :  { %v55_v9 = vsub.s32 0, %v54_v8  ;;  %v59_v11 = vsub.s32 1, %v54_v8  ;;  %s218_s5 = scalar_lea.vmem %s137_s28, 128  ;;  %p223_p11 = scmp.lt.s32.totalorder %s137_s28, %s137_s28 }
  0x20   :  { %p219_p10 = scmp.ne.s32.totalorder %s137_s28, %s218_s5  ;;  %p224_p12 = scmp.lt.s32.totalorder %s218_s5, %s218_s5 }
  0x21   :  { %102 = vmatpush1.bf16.msra.mxu0 %v177_v4  ;;  %v56_v12 = vrot.slane %v51_v10, %v55_v9  ;;  %v60_v13 = vrot.slane %v51_v10, %v59_v11 }
  0x22   :  { %p225_p13 = por %p224_p12, %p223_p11 }
  0x24   :  { %164 = vmatmul.mubr.msk.bf16.vlgmr.msra.gmra.mxu0 %vm83_vm0, %v46_v6  ;;  %p226_p0 = pnand %p225_p13, %p219_p10 }
  0xe4   :  { %v121_v14 = vpop.f32.mrf.mxu0 }
  0xe5   :  { %v122_v15 = vadd.f32 %v121_v14, %v56_v12 }
  0xe6   :  { %v123_v16 = vpop.f32.mrf.mxu0 }
  0xe7   :  { %128 = vst [vmem:[#allocation7] sm:$0xff] %v122_v15  ;;  %v124_v17 = vadd.f32 %v123_v16, %v60_v13 }
  0xe8   :  { %v125_v18 = vpop.f32.mrf.mxu0 }
  0xe9   :  { %229 = shalt.err (!%p226_p0)
}
  0xea   :  { %139 = dma.vmem_to_hbm [thread:$0]  %s137_s28, 128, %s316_s3, [#allocation4]   ;;  %129 = vst [vmem:[#allocation8] sm:$0xff] %v124_v17  ;;  %v126_v19 = vpop.f32.mrf.mxu0 }
  0xeb   :  { %s238_s7 = scalar_lea.vmem %s147_s30, 128  ;;  %p243_p2 = scmp.lt.s32.totalorder %s147_s30, %s147_s30 }
  0xec   :  { %p239_p1 = scmp.ne.s32.totalorder %s147_s30, %s238_s7  ;;  %p244_p3 = scmp.lt.s32.totalorder %s238_s7, %s238_s7 }
  0xee   :  { %p245_p4 = por %p244_p3, %p243_p2 }
  0xf0   :  { %p246_p5 = pnand %p245_p4, %p239_p1 }
  0xf2   :  { %249 = shalt.err (!%p246_p5)
}
  0xf3   :  { %149 = dma.vmem_to_hbm [thread:$0]  %s147_s30, 128, %s317_s4, [#allocation9]  }
  0xf4   :  { %262 = dma.done.wait [#allocation4], 128  }
  0xf5   :  { %263 = vsyncadd [#allocation4], 4294967168 }
  0xf6   :  { %264 = dma.done.wait [#allocation9], 128  }
  0xf7   :  { %265 = vsyncadd [#allocation9], 4294967168 }
  0xf8   :  { %156 = vsyncpa [#allocation3], 1 }
  0xf9   :  { %157 = vsyncpa [#allocation6], 1 }
  0xfa   :  { %158 = vsyncpa [#allocation4], 1 }
  0xfb   :  { %159 = vsyncpa [#allocation9], 1 }

</bundles_post_ra>
